<compile_context>
chip_gen: v7x
topology: tpu7x:2x2x1
jax: 0.10.0
libtpu: 0.0.40
codegen_flags: <defaults>
</compile_context>

<pallas_src>
import functools

import jax
import jax.numpy as jnp
from jax import lax
from jax.experimental import pallas as pl
from jax.experimental.pallas import tpu as pltpu


def _round_up(n: int, m: int) -> int:
    return ((n + m - 1) // m) * m


def _coverage_matrix(G: int) -> jnp.ndarray:
    """(9, G*G) 0/1 matrix: cov[k, p] == 1 iff input pixel p is read by conv tap k
    (3x3 kernel, padding=1), summed over all output positions."""
    p = jnp.arange(G * G)
    r = p // G
    c = p % G
    rows = []
    for ki in range(3):
        rlo = max(0, ki - 1)
        rhi = G if ki >= 1 else G - 1
        for kj in range(3):
            clo = max(0, kj - 1)
            chi = G if kj >= 1 else G - 1
            rows.append(((r >= rlo) & (r < rhi) & (c >= clo) & (c < chi))
                        .astype(jnp.float32))
    return jnp.stack(rows, axis=0)                       # (9, G*G), k = ki*3 + kj


def _mlp_kernel(obs_ref, grid_ref, sent_ref,
                w1o_ref, w1g_ref, w1s_ref, b1_ref,
                w2_ref, b2_ref, w3_ref, b3_ref, w4_ref, b4_ref,
                out_ref):
    """One row block through the fused 4-layer MLP.

    Layer 1 is three partial matmuls over the un-concatenated inputs (obs,
    flattened grid, sentence).  Matmuls run in the weights' dtype (bf16/f32)
    with f32 accumulation; bias adds + ReLU stay in f32 and the result is
    downcast once per layer so inter-layer activations are staged in bf16."""
    cdt = w2_ref.dtype

    h = jnp.dot(obs_ref[...], w1o_ref[...], preferred_element_type=jnp.float32)
    h = h + jnp.dot(grid_ref[...], w1g_ref[...], preferred_element_type=jnp.float32)
    h = h + jnp.dot(sent_ref[...], w1s_ref[...], preferred_element_type=jnp.float32)
    h = jnp.maximum(h + b1_ref[...], 0.0).astype(cdt)

    h = jnp.dot(h, w2_ref[...], preferred_element_type=jnp.float32)
    h = jnp.maximum(h + b2_ref[...], 0.0).astype(cdt)

    h = jnp.dot(h, w3_ref[...], preferred_element_type=jnp.float32)
    h = jnp.maximum(h + b3_ref[...], 0.0).astype(cdt)

    out_ref[...] = (jnp.dot(h, w4_ref[...], preferred_element_type=jnp.float32)
                    + b4_ref[...]).astype(out_ref.dtype)


def multi_agent_gnn_forward(obs, grid_obs, sentence, params, *,
                            compute_dtype=jnp.bfloat16, block_m: int = 512):
    """obs: (B,N,D_obs), grid_obs: (B,N,G,G), sentence: (B,N,D_sent)
       -> logits (B, N, 2*action_dim) in compute_dtype (bf16 by default;
       logits lose ~3 decimal digits vs f32 — acceptable for policy logits)."""
    B, N, D_obs = obs.shape
    G = grid_obs.shape[-1]
    D_sent = sentence.shape[-1]
    M = B * N
    emb = params["conv_b"].shape[0]
    A2 = params["w4"].shape[-1]

    # ---- host-side fold: conv(3x3,pad=1) + spatial mean + layer 1 ----------
    wc = params["conv_w"].reshape(emb, 9).T.astype(jnp.float32)      # (9, emb)
    cov = _coverage_matrix(G)                                        # (9, G*G)
    w_eff = (cov.T @ wc) * (1.0 / float(G * G))                      # (G*G, emb)

    w1 = params["w1"].astype(jnp.float32)                            # (D_obs+emb+D_sent, 512)
    w1o = w1[:D_obs]                                                 # (D_obs, 512)
    w1v = w1[D_obs:D_obs + emb]                                      # (emb, 512)
    w1s = w1[D_obs + emb:]                                           # (D_sent, 512)
    w1g = w_eff @ w1v                                                # (G*G, 512)
    b1f = params["b1"] + params["conv_b"] @ w1v                      # (512,)

    # ---- adaptive row blocking / output lane padding ------------------------
    A2_pad = _round_up(A2, 128)
    block_m = max(16, _round_up(block_m, 16))
    if M <= block_m:
        block_m_eff = _round_up(M, 16)       # single block; grid is dropped below
    else:
        block_m_eff = block_m                # >= 2 blocks -> v7x megacore can split
    M_pad = _round_up(M, block_m_eff)
    n_blocks = M_pad // block_m_eff

    # ---- operand prep: cast BEFORE padding, no concat staging ---------------
    def prep_rows(a2d):
        a2d = a2d.astype(compute_dtype)
        if M_pad != M:
            a2d = jnp.pad(a2d, ((0, M_pad - M), (0, 0)))
        return a2d

    x_obs = prep_rows(obs.reshape(M, D_obs))
    x_grid = prep_rows(grid_obs.reshape(M, G * G))
    x_sent = prep_rows(sentence.reshape(M, D_sent))

    w1o_c = w1o.astype(compute_dtype)
    w1g_c = w1g.astype(compute_dtype)
    w1s_c = w1s.astype(compute_dtype)
    w2_c = params["w2"].astype(compute_dtype)
    w3_c = params["w3"].astype(compute_dtype)
    w4_c = jnp.pad(params["w4"].astype(jnp.float32),
                   ((0, 0), (0, A2_pad - A2))).astype(compute_dtype)

    b1_c = b1f.reshape(1, -1).astype(jnp.float32)
    b2_c = params["b2"].reshape(1, -1).astype(jnp.float32)
    b3_c = params["b3"].reshape(1, -1).astype(jnp.float32)
    b4_c = jnp.pad(params["b4"].reshape(1, -1).astype(jnp.float32),
                   ((0, 0), (0, A2_pad - A2)))

    H1, H2, H3 = w1o_c.shape[1], w2_c.shape[1], w3_c.shape[1]        # 512, 256, 256
    K_total = D_obs + G * G + D_sent

    inputs = (x_obs, x_grid, x_sent,
              w1o_c, w1g_c, w1s_c, b1_c,
              w2_c, b2_c, w3_c, b3_c, w4_c, b4_c)
    weights = (w1o_c, w1g_c, w1s_c, w2_c, w3_c, w4_c, b1_c, b2_c, b3_c, b4_c)

    cbytes = jnp.dtype(compute_dtype).itemsize
    flops = 2 * M_pad * (K_total * H1 + H1 * H2 + H2 * H3 + H3 * A2_pad)
    bytes_accessed = int(
        sum(int(a.size) * a.dtype.itemsize for a in (x_obs, x_grid, x_sent))
        + sum(int(w.size) * w.dtype.itemsize for w in weights)
        + M_pad * A2_pad * cbytes)
    cost = pl.CostEstimate(flops=flops, transcendentals=0,
                           bytes_accessed=bytes_accessed)

    # VMEM budget: resident weights + double-buffered row blocks + f32 intermediates.
    resident_bytes = sum(int(w.size) * w.dtype.itemsize for w in weights)
    block_io_bytes = block_m_eff * (K_total + A2_pad) * cbytes
    vmem_est = 2 * (resident_bytes + block_io_bytes) + 4 * block_m_eff * H1 * 4
    vmem_limit = None
    if vmem_est > 32 * 1024 * 1024:
        vmem_limit = int(min(vmem_est * 5 // 4, 100 * 1024 * 1024))

    out_shape = jax.ShapeDtypeStruct((M_pad, A2_pad), compute_dtype)

    if n_blocks == 1:
        # Small M: drop the grid, keep every operand whole in VMEM.
        vmem_spec = pl.BlockSpec(memory_space=pltpu.MemorySpace.VMEM)
        out = pl.pallas_call(
            _mlp_kernel,
            out_shape=out_shape,
            in_specs=[vmem_spec] * len(inputs),
            out_specs=vmem_spec,
            compiler_params=pltpu.CompilerParams(vmem_limit_bytes=vmem_limit),
            cost_estimate=cost,
        )(*inputs)
    else:
        def row_spec(width):
            return pl.BlockSpec((block_m_eff, width), lambda i: (i, 0))

        def resident_spec(arr):
            return pl.BlockSpec(arr.shape, lambda i: (0, 0))

        out = pl.pallas_call(
            _mlp_kernel,
            out_shape=out_shape,
            grid=(n_blocks,),
            in_specs=[row_spec(D_obs), row_spec(G * G), row_spec(D_sent),
                      resident_spec(w1o_c), resident_spec(w1g_c),
                      resident_spec(w1s_c), resident_spec(b1_c),
                      resident_spec(w2_c), resident_spec(b2_c),
                      resident_spec(w3_c), resident_spec(b3_c),
                      resident_spec(w4_c), resident_spec(b4_c)],
            out_specs=row_spec(A2_pad),
            compiler_params=pltpu.CompilerParams(
                dimension_semantics=("parallel",),
                vmem_limit_bytes=vmem_limit),
            cost_estimate=cost,
        )(*inputs)

    return out[:M, :A2].reshape(B, N, A2)


def reference_forward(obs, grid_obs, sentence, params):
    """Pure-JAX reference matching the PyTorch forward (explicit conv, f32)."""
    B, N, _ = obs.shape
    G = grid_obs.shape[-1]
    x = grid_obs.reshape(B * N, 1, G, G)
    conv = lax.conv_general_dilated(
        x, params["conv_w"], window_strides=(1, 1), padding=((1, 1), (1, 1)),
        dimension_numbers=("NCHW", "OIHW", "NCHW"))
    conv = conv + params["conv_b"][None, :, None, None]
    visits = conv.mean(axis=(2, 3)).reshape(B, N, -1)
    xcat = jnp.concatenate([obs, visits, sentence], axis=-1)
    h = jnp.maximum(xcat @ params["w1"] + params["b1"], 0.0)
    h = jnp.maximum(h @ params["w2"] + params["b2"], 0.0)
    h = jnp.maximum(h @ params["w3"] + params["b3"], 0.0)
    return h @ params["w4"] + params["b4"]


def init_params(key, node_input_dim, sentence_dim, emb_dim, action_dim):
    D_in = sentence_dim + node_input_dim + emb_dim
    ks = jax.random.split(key, 10)

    def lin_w(k, fan_in, fan_out):
        return (jax.random.normal(k, (fan_in, fan_out), jnp.float32)
                / jnp.sqrt(jnp.float32(fan_in)))

    def lin_b(k, fan_out):
        return jax.random.normal(k, (fan_out,), jnp.float32) * 0.01

    return {
        "conv_w": jax.random.normal(ks[0], (emb_dim, 1, 3, 3), jnp.float32) / 3.0,
        "conv_b": jax.random.normal(ks[1], (emb_dim,), jnp.float32) * 0.1,
        "w1": lin_w(ks[2], D_in, 512), "b1": lin_b(ks[3], 512),
        "w2": lin_w(ks[4], 512, 256), "b2": lin_b(ks[5], 256),
        "w3": lin_w(ks[6], 256, 256), "b3": lin_b(ks[7], 256),
        "w4": lin_w(ks[8], 256, 2 * action_dim), "b4": lin_b(ks[9], 2 * action_dim),
    }


if __name__ == "__main__":
    # Small shapes consistent with the module's forward.
    B, N = 2, 4                 # batch, n_agents
    node_input_dim = 8          # obs feature dim (no position/velocity keys)
    sentence_dim = 16
    emb_dim = 32
    action_dim = 3
    G = 8                       # grid_obs spatial size

    key = jax.random.PRNGKey(0)
    k_obs, k_grid, k_sent, k_par = jax.random.split(key, 4)
    obs = jax.random.normal(k_obs, (B, N, node_input_dim), jnp.float32)
    grid_obs = jax.random.normal(k_grid, (B, N, G, G), jnp.float32)
    sentence = jax.random.normal(k_sent, (B, N, sentence_dim), jnp.float32)
    params = init_params(k_par, node_input_dim, sentence_dim, emb_dim, action_dim)

    ref = reference_forward(obs, grid_obs, sentence, params)

    # f32 path (single-block, grid-free): exact-semantics check vs reference.
    fwd_f32 = jax.jit(functools.partial(
        multi_agent_gnn_forward, compute_dtype=jnp.float32))
    logits_f32 = jax.block_until_ready(fwd_f32(obs, grid_obs, sentence, params))
    assert logits_f32.shape == (B, N, 2 * action_dim), logits_f32.shape
    assert jnp.allclose(logits_f32, ref, rtol=1e-3, atol=1e-3), (
        float(jnp.max(jnp.abs(logits_f32 - ref))))

    # bf16 path (default / production): MXU-native dtype, f32 accumulation.
    fwd_bf16 = jax.jit(functools.partial(
        multi_agent_gnn_forward, compute_dtype=jnp.bfloat16))
    logits_bf16 = jax.block_until_ready(fwd_bf16(obs, grid_obs, sentence, params))
    assert logits_bf16.shape == (B, N, 2 * action_dim), logits_bf16.shape
    assert jnp.allclose(logits_bf16.astype(jnp.float32), ref,
                        rtol=1e-1, atol=1e-1), (
        float(jnp.max(jnp.abs(logits_bf16.astype(jnp.float32) - ref))))

    # Larger batch: exercises the gridded, multi-block (megacore-friendly) path.
    Bl, Nl = 128, 8             # M = 1024 -> two 512-row blocks
    kb_obs, kb_grid, kb_sent = jax.random.split(jax.random.PRNGKey(1), 3)
    obs_l = jax.random.normal(kb_obs, (Bl, Nl, node_input_dim), jnp.float32)
    grid_l = jax.random.normal(kb_grid, (Bl, Nl, G, G), jnp.float32)
    sent_l = jax.random.normal(kb_sent, (Bl, Nl, sentence_dim), jnp.float32)
    ref_l = reference_forward(obs_l, grid_l, sent_l, params)
    logits_l = jax.block_until_ready(fwd_bf16(obs_l, grid_l, sent_l, params))
    assert logits_l.shape == (Bl, Nl, 2 * action_dim), logits_l.shape
    assert jnp.allclose(logits_l.astype(jnp.float32), ref_l,
                        rtol=1e-1, atol=1e-1), (
        float(jnp.max(jnp.abs(logits_l.astype(jnp.float32) - ref_l))))

    print("KERNEL_OK")
</pallas_src>

<mosaic_0001>
module attributes {stable_mosaic.version = 11 : i64} {
  func.func @_mlp_kernel(%arg0: memref<16x8xf32, #tpu.memory_space<vmem>>, %arg1: memref<16x64xf32, #tpu.memory_space<vmem>>, %arg2: memref<16x16xf32, #tpu.memory_space<vmem>>, %arg3: memref<8x512xf32, #tpu.memory_space<vmem>>, %arg4: memref<64x512xf32, #tpu.memory_space<vmem>>, %arg5: memref<16x512xf32, #tpu.memory_space<vmem>>, %arg6: memref<1x512xf32, #tpu.memory_space<vmem>>, %arg7: memref<512x256xf32, #tpu.memory_space<vmem>>, %arg8: memref<1x256xf32, #tpu.memory_space<vmem>>, %arg9: memref<256x256xf32, #tpu.memory_space<vmem>>, %arg10: memref<1x256xf32, #tpu.memory_space<vmem>>, %arg11: memref<256x128xf32, #tpu.memory_space<vmem>>, %arg12: memref<1x128xf32, #tpu.memory_space<vmem>>, %arg13: memref<16x128xf32, #tpu.memory_space<vmem>>) attributes {dimension_semantics = [], scalar_prefetch = 0 : i64, scratch_operands = 0 : i64, tpu.core_type = #tpu.core_type<tc>} {
    %c0 = arith.constant 0 : index
    %c0_0 = arith.constant 0 : index
    %0 = vector.load %arg0[%c0, %c0_0] : memref<16x8xf32, #tpu.memory_space<vmem>>, vector<16x8xf32>
    %c0_1 = arith.constant 0 : index
    %c0_2 = arith.constant 0 : index
    %1 = vector.load %arg3[%c0_1, %c0_2] : memref<8x512xf32, #tpu.memory_space<vmem>>, vector<8x512xf32>
    %cst = arith.constant dense<0.000000e+00> : vector<16x512xf32>
    %2 = tpu.matmul %0, %1, %cst {dimension_numbers = #tpu.dot_dimension_numbers<[1], [0], [0], [1], [0, 0, 1, 1], [], []>} : vector<16x8xf32>, vector<8x512xf32>, vector<16x512xf32> -> vector<16x512xf32>
    %c0_3 = arith.constant 0 : index
    %c0_4 = arith.constant 0 : index
    %3 = vector.load %arg1[%c0_3, %c0_4] : memref<16x64xf32, #tpu.memory_space<vmem>>, vector<16x64xf32>
    %c0_5 = arith.constant 0 : index
    %c0_6 = arith.constant 0 : index
    %4 = vector.load %arg4[%c0_5, %c0_6] : memref<64x512xf32, #tpu.memory_space<vmem>>, vector<64x512xf32>
    %cst_7 = arith.constant dense<0.000000e+00> : vector<16x512xf32>
    %5 = tpu.matmul %3, %4, %cst_7 {dimension_numbers = #tpu.dot_dimension_numbers<[1], [0], [0], [1], [0, 0, 1, 1], [], []>} : vector<16x64xf32>, vector<64x512xf32>, vector<16x512xf32> -> vector<16x512xf32>
    %6 = arith.addf %2, %5 : vector<16x512xf32>
    %c0_8 = arith.constant 0 : index
    %c0_9 = arith.constant 0 : index
    %7 = vector.load %arg2[%c0_8, %c0_9] : memref<16x16xf32, #tpu.memory_space<vmem>>, vector<16x16xf32>
    %c0_10 = arith.constant 0 : index
    %c0_11 = arith.constant 0 : index
    %8 = vector.load %arg5[%c0_10, %c0_11] : memref<16x512xf32, #tpu.memory_space<vmem>>, vector<16x512xf32>
    %cst_12 = arith.constant dense<0.000000e+00> : vector<16x512xf32>
    %9 = tpu.matmul %7, %8, %cst_12 {dimension_numbers = #tpu.dot_dimension_numbers<[1], [0], [0], [1], [0, 0, 1, 1], [], []>} : vector<16x16xf32>, vector<16x512xf32>, vector<16x512xf32> -> vector<16x512xf32>
    %10 = arith.addf %6, %9 : vector<16x512xf32>
    %c0_13 = arith.constant 0 : index
    %c0_14 = arith.constant 0 : index
    %11 = vector.load %arg6[%c0_13, %c0_14] : memref<1x512xf32, #tpu.memory_space<vmem>>, vector<1x512xf32>
    %12 = vector.broadcast %11 : vector<1x512xf32> to vector<16x512xf32>
    %13 = arith.addf %10, %12 : vector<16x512xf32>
    %cst_15 = arith.constant 0.000000e+00 : f32
    %14 = vector.broadcast %cst_15 : f32 to vector<16x512xf32>
    %15 = arith.maximumf %13, %14 : vector<16x512xf32>
    %c0_16 = arith.constant 0 : index
    %c0_17 = arith.constant 0 : index
    %16 = vector.load %arg7[%c0_16, %c0_17] : memref<512x256xf32, #tpu.memory_space<vmem>>, vector<512x256xf32>
    %cst_18 = arith.constant dense<0.000000e+00> : vector<16x256xf32>
    %17 = tpu.matmul %15, %16, %cst_18 {dimension_numbers = #tpu.dot_dimension_numbers<[1], [0], [0], [1], [0, 0, 1, 1], [], []>} : vector<16x512xf32>, vector<512x256xf32>, vector<16x256xf32> -> vector<16x256xf32>
    %c0_19 = arith.constant 0 : index
    %c0_20 = arith.constant 0 : index
    %18 = vector.load %arg8[%c0_19, %c0_20] : memref<1x256xf32, #tpu.memory_space<vmem>>, vector<1x256xf32>
    %19 = vector.broadcast %18 : vector<1x256xf32> to vector<16x256xf32>
    %20 = arith.addf %17, %19 : vector<16x256xf32>
    %cst_21 = arith.constant 0.000000e+00 : f32
    %21 = vector.broadcast %cst_21 : f32 to vector<16x256xf32>
    %22 = arith.maximumf %20, %21 : vector<16x256xf32>
    %c0_22 = arith.constant 0 : index
    %c0_23 = arith.constant 0 : index
    %23 = vector.load %arg9[%c0_22, %c0_23] : memref<256x256xf32, #tpu.memory_space<vmem>>, vector<256x256xf32>
    %cst_24 = arith.constant dense<0.000000e+00> : vector<16x256xf32>
    %24 = tpu.matmul %22, %23, %cst_24 {dimension_numbers = #tpu.dot_dimension_numbers<[1], [0], [0], [1], [0, 0, 1, 1], [], []>} : vector<16x256xf32>, vector<256x256xf32>, vector<16x256xf32> -> vector<16x256xf32>
    %c0_25 = arith.constant 0 : index
    %c0_26 = arith.constant 0 : index
    %25 = vector.load %arg10[%c0_25, %c0_26] : memref<1x256xf32, #tpu.memory_space<vmem>>, vector<1x256xf32>
    %26 = vector.broadcast %25 : vector<1x256xf32> to vector<16x256xf32>
    %27 = arith.addf %24, %26 : vector<16x256xf32>
    %cst_27 = arith.constant 0.000000e+00 : f32
    %28 = vector.broadcast %cst_27 : f32 to vector<16x256xf32>
    %29 = arith.maximumf %27, %28 : vector<16x256xf32>
    %c0_28 = arith.constant 0 : index
    %c0_29 = arith.constant 0 : index
    %30 = vector.load %arg11[%c0_28, %c0_29] : memref<256x128xf32, #tpu.memory_space<vmem>>, vector<256x128xf32>
    %cst_30 = arith.constant dense<0.000000e+00> : vector<16x128xf32>
    %31 = tpu.matmul %29, %30, %cst_30 {dimension_numbers = #tpu.dot_dimension_numbers<[1], [0], [0], [1], [0, 0, 1, 1], [], []>} : vector<16x256xf32>, vector<256x128xf32>, vector<16x128xf32> -> vector<16x128xf32>
    %c0_31 = arith.constant 0 : index
    %c0_32 = arith.constant 0 : index
    %32 = vector.load %arg12[%c0_31, %c0_32] : memref<1x128xf32, #tpu.memory_space<vmem>>, vector<1x128xf32>
    %33 = vector.broadcast %32 : vector<1x128xf32> to vector<16x128xf32>
    %34 = arith.addf %31, %33 : vector<16x128xf32>
    %c0_33 = arith.constant 0 : index
    %c0_34 = arith.constant 0 : index
    %35 = vector.load %arg13[%c0_33, %c0_34] : memref<16x128xf32, #tpu.memory_space<vmem>>, vector<16x128xf32>
    tpu.vector_store %arg13[%c0_33, %c0_34], %34 {strides = array<i32>} : memref<16x128xf32, #tpu.memory_space<vmem>>, vector<16x128xf32>,
    return
  }
}

</mosaic_0001>

<bundles_post_ra>
// kernel: multi_agent_gnn_forward.1
= control target key start
LH: loop header
LB: loop body
LE: loop exit
PB: predicated region body
PF: predicated region fallthrough
CT: control target
= control target key end

     0   :  { %18 = vsyncpa [#allocation3], 0  ;;  %s1582_s25 = smov [#allocation2]   ;;  %s2410_s0 = inlined_call_operand.vmem [shape: f32[16,8], index: 0, kind: input, shape index: {}]   ;;  %s2411_s1 = inlined_call_operand.vmem [shape: f32[16,64], index: 1, kind: input, shape index: {}]   ;;  %s2412_s2 = inlined_call_operand.vmem [shape: f32[16,16], index: 2, kind: input, shape index: {}]   ;;  %s2413_s3 = inlined_call_operand.vmem [shape: f32[8,512], index: 3, kind: input, shape index: {}]   ;;  %s2414_s4 = inlined_call_operand.vmem [shape: f32[64,512], index: 4, kind: input, shape index: {}]   ;;  %s2415_s5 = inlined_call_operand.vmem [shape: f32[16,512], index: 5, kind: input, shape index: {}]   ;;  %s2416_s6 = inlined_call_operand.vmem [shape: f32[1,512], index: 6, kind: input, shape index: {}]   ;;  %s2417_s7 = inlined_call_operand.vmem [shape: f32[512,256], index: 7, kind: input, shape index: {}]   ;;  %s2418_s8 = inlined_call_operand.vmem [shape: f32[1,256], index: 8, kind: input, shape index: {}]   ;;  %s2419_s9 = inlined_call_operand.hbm [shape: f32[256,256], index: 9, kind: input, shape index: {}]   ;;  %s2420_s10 = inlined_call_operand.vmem [shape: f32[1,256], index: 10, kind: input, shape index: {}]   ;;  %s2421_s11 = inlined_call_operand.vmem [shape: f32[256,128], index: 11, kind: input, shape index: {}]   ;;  %s2422_s12 = inlined_call_operand.vmem [shape: f32[1,128], index: 12, kind: input, shape index: {}]   ;;  %s2423_s13 = inlined_call_operand.vmem [shape: f32[16,128], index: 13, kind: output, shape index: {}]  }
   0x1   :  { %s42_s26 = sshll.u32 %s1582_s25, 4  ;;  %s1558_s29 = scalar_lea.hbm %s2419_s9, 8192  ;;  %s43_s26 = int_to_ptr.vmem [resolvable:$true] %s42_s26 }
   0x2   :  { %p1559_p0 = scmp.ne.s32.totalorder %s2419_s9, %s1558_s29  ;;  %p1562_p1 = scmp.lt.u32.totalorder %s1558_s29, %s2419_s9 }
   0x4   :  { %p1564_p2 = pnand %p1562_p1, %p1559_p0 }
   0x6   :  { %1567 = shalt.err (!%p1564_p2)
}
   0x7   :  { %s1568_s17 = scalar_lea.vmem %s43_s26, 8192  ;;  %p1573_p4 = scmp.lt.s32.totalorder %s43_s26, %s43_s26 }
   0x8   :  { %p1569_p3 = scmp.ne.s32.totalorder %s43_s26, %s1568_s17  ;;  %p1574_p5 = scmp.lt.s32.totalorder %s1568_s17, %s1568_s17 }
   0xa   :  { %p1575_p6 = por %p1574_p5, %p1573_p4 }
   0xc   :  { %p1576_p7 = pnand %p1575_p6, %p1569_p3 }
   0xe   :  { %1579 = shalt.err (!%p1576_p7)
}
   0xf   :  { %s1583_s18 = smov 256   ;;  %s1584_s19 = smov 16  }
  0x10   :  { %48 = dma.hbm_to_vmem [thread:$0]  %s2419_s9, 8192, %s43_s26, [#allocation3], %s1583_s18, %s1583_s18, %s1584_s19  }
  0x11   :  { %1580 = dma.done.wait [#allocation3], 8192  }
  0x12   :  { %1581 = vsyncadd [#allocation3], 4294959104  ;;  %v1585_v0 = vmov 0.0   ;;  %v61_v1 = vld [vmem:[%s2413_s3 + $0x8] sm:$0xff]  ;;  %v60_v2 = vld [vmem:[%s2413_s3] sm:$0xff]  ;;  %vm259_vm0 = vcmask 64512  }
  0x13   :  { %330 = vmatprep.mubr.f32.mxu0 %v1585_v0  ;;  %169 = vmatprep.mubr.f32.mxu1 %v1585_v0  ;;  %v67_v3 = vld [vmem:[%s2414_s4 + $0x8] sm:$0xff]  ;;  %v58_v5 = vld [vmem:[%s2410_s0] sm:$0xff]  ;;  %v1694_v9 = vld [vmem:[%s2413_s3 + $0x18] sm:$0xff]  ;;  %vm430_vm1 = vcmask 130048   ;;  %vm98_vm2 = vcmask 523264  }
  0x14   :  { %266 = vmatprep.subr.mxu0 %v61_v1  ;;  %v71_v4 = vld [vmem:[%s2414_s4 + $0x28] sm:$0xff]  ;;  %v66_v6 = vld [vmem:[%s2414_s4] sm:$0xff]  ;;  %v1712_v14 = vld [vmem:[%s2413_s3 + $0x10] sm:$0xff] }
  0x15   :  { %267 = vmatpush1.msra.mxu0 %v60_v2  ;;  %v1264_v7 = vpack.c.bf16 %v71_v4, %v67_v3  ;;  %v70_v8 = vld [vmem:[%s2414_s4 + $0x20] sm:$0xff]  ;;  %v75_v10 = vld [vmem:[%s2414_s4 + $0x48] sm:$0xff]  ;;  %v69_v36 = vld [vmem:[%s2414_s4 + $0x18] sm:$0xff] }
  0x16   :  { %1217 = vmatmul.mubr.msk.f32.vlgmr.msra.gmra.mrb[0].mxu0 %vm259_vm0, %v58_v5  ;;  %v1266_v11 = vpack.c.bf16 %v70_v8, %v66_v6  ;;  %343 = vmatprep.subr.mxu0 %v1694_v9  ;;  %v79_v12 = vld [vmem:[%s2414_s4 + $0x68] sm:$0xff]  ;;  %v74_v16 = vld [vmem:[%s2414_s4 + $0x40] sm:$0xff]  ;;  %v73_v37 = vld [vmem:[%s2414_s4 + $0x38] sm:$0xff] }
  0x17   :  { %v1707_v13 = vld [vmem:[%s2410_s0 + $0x8] sm:$0xff]  ;;  %1265 = vmatprep.subr.bf16.mxu1 %v1264_v7  ;;  %336 = vmatprep.mubr.f32.mxu0 %v1585_v0  ;;  %v1268_v15 = vpack.c.bf16 %v79_v12, %v75_v10  ;;  %v78_v17 = vld [vmem:[%s2414_s4 + $0x60] sm:$0xff]  ;;  %v1280_v40 = vpack.c.bf16 %v73_v37, %v69_v36  ;;  %v68_v41 = vld [vmem:[%s2414_s4 + $0x10] sm:$0xff] }
  0x18   :  { %v83_v18 = vld [vmem:[%s2414_s4 + $0x88] sm:$0xff]  ;;  %1267 = vmatpush1.bf16.msra.mxu1 %v1266_v11  ;;  %344 = vmatpush1.msra.mxu0 %v1712_v14  ;;  %v1270_v19 = vpack.c.bf16 %v78_v17, %v74_v16  ;;  %v82_v25 = vld [vmem:[%s2414_s4 + $0x80] sm:$0xff]  ;;  %v72_v42 = vld [vmem:[%s2414_s4 + $0x30] sm:$0xff] }
  0x19   :  { %v87_v20 = vld [vmem:[%s2414_s4 + $0xa8] sm:$0xff]  ;;  %1269 = vmatprep.subr.bf16.mxu1 %v1268_v15  ;;  %v86_v26 = vld [vmem:[%s2414_s4 + $0xa0] sm:$0xff]  ;;  %v77_v45 = vld [vmem:[%s2414_s4 + $0x58] sm:$0xff]  ;;  %v1282_v50 = vpack.c.bf16 %v72_v42, %v68_v41 }
  0x1a   :  { %v423_v21 = vld [vmem:[%s2415_s5 + $0x8] sm:$0xff]  ;;  %v1272_v23 = vpack.c.bf16 %v87_v20, %v83_v18  ;;  %v422_v27 = vld [vmem:[%s2415_s5] sm:$0xff]  ;;  %1218 = vmatmul.mubr.msk.f32.gmra.mrb[2].mxu0 %vm259_vm0, %v1707_v13  ;;  %v1274_v32 = vpack.c.bf16 %v86_v26, %v82_v25  ;;  %v81_v46 = vld [vmem:[%s2414_s4 + $0x78] sm:$0xff] }
  0x1b   :  { %v427_v22 = vld [vmem:[%s2415_s5 + $0x28] sm:$0xff]  ;;  %v426_v28 = vld [vmem:[%s2415_s5 + $0x20] sm:$0xff]  ;;  %407 = vmatprep.mubr.f32.mxu0 %v1585_v0  ;;  %v76_v47 = vld [vmem:[%s2414_s4 + $0x50] sm:$0xff]  ;;  %v1284_v54 = vpack.c.bf16 %v81_v46, %v77_v45 }
  0x1c   :  { %v1296_v24 = vpack.c.bf16 %v427_v22, %v423_v21  ;;  %v91_v29 = vld [vmem:[%s2414_s4 + $0xc8] sm:$0xff]  ;;  %v1298_v31 = vpack.c.bf16 %v426_v28, %v422_v27  ;;  %1271 = vmatpush1.bf16.msra.mxu1 %v1270_v19  ;;  %v90_v34 = vld [vmem:[%s2414_s4 + $0xc0] sm:$0xff]  ;;  %v80_v48 = vld [vmem:[%s2414_s4 + $0x70] sm:$0xff] }
  0x1d   :  { %v95_v30 = vld [vmem:[%s2414_s4 + $0xe8] sm:$0xff]  ;;  %1273 = vmatprep.subr.bf16.mxu1 %v1272_v23  ;;  %v94_v35 = vld [vmem:[%s2414_s4 + $0xe0] sm:$0xff]  ;;  %v640_v51 = vld [vmem:[%s2417_s7 + $0x18] sm:$0xff]  ;;  %v1286_v4 = vpack.c.bf16 %v80_v48, %v76_v47 }
  0x1e   :  { %1297 = vmatprep.subr.bf16.mxu0 %v1296_v24  ;;  %v1276_v33 = vpack.c.bf16 %v95_v30, %v91_v29  ;;  %1219 = vmatmul.mubr.msk.f32.vlgmr.msra.gmra.mrb[4].mxu0 %vm259_vm0, %v58_v5  ;;  %v1772_v38 = vld [vmem:[%s2412_s2] sm:$0xff]  ;;  %v1278_v39 = vpack.c.bf16 %v94_v35, %v90_v34  ;;  %v1790_v44 = vld [vmem:[%s2412_s2 + $0x8] sm:$0xff]  ;;  %v639_v53 = vld [vmem:[%s2417_s7 + $0x10] sm:$0xff] }
  0x1f   :  { %1299 = vmatpush1.bf16.msra.mxu0 %v1298_v31  ;;  %501 = vmatprep.mubr.f32.mxu0 %v1585_v0  ;;  %v1785_v43 = vld [vmem:[%s2411_s1] sm:$0xff]  ;;  %v638_v49 = vld [vmem:[%s2417_s7 + $0x8] sm:$0xff]  ;;  %v85_v55 = vld [vmem:[%s2414_s4 + $0x98] sm:$0xff] }
  0x20   :  { %1275 = vmatpush1.bf16.msra.mxu1 %v1274_v32  ;;  %v637_v52 = vld [vmem:[%s2417_s7] sm:$0xff]  ;;  %v1304_v56 = vpack.c.bf16 %v640_v51, %v638_v49  ;;  %v642_v58 = vld [vmem:[%s2417_s7 + $0x28] sm:$0xff]  ;;  %v644_v59 = vld [vmem:[%s2417_s7 + $0x38] sm:$0xff] }
  0x21   :  { %1277 = vmatprep.subr.bf16.mxu1 %v1276_v33  ;;  %v1306_v57 = vpack.c.bf16 %v639_v53, %v637_v52  ;;  %v89_v60 = vld [vmem:[%s2414_s4 + $0xb8] sm:$0xff]  ;;  %v1308_v61 = vpack.c.bf16 %v644_v59, %v642_v58  ;;  %v641_v62 = vld [vmem:[%s2417_s7 + $0x20] sm:$0xff]  ;;  %v643_v63 = vld [vmem:[%s2417_s7 + $0x30] sm:$0xff] }
  0x22   :  { %1221 = vmatmul.mubr.msk.f32.vlgmr.msra.gmra.mrb[0].mxu0 %vm430_vm1, %v1772_v38  ;;  %1305 = vmatprep.subr.bf16.mxu0 %v1304_v56  ;;  %v646_v1 = vld [vmem:[%s2417_s7 + $0x48] sm:$0xff]  ;;  %v648_v2 = vld [vmem:[%s2417_s7 + $0x58] sm:$0xff]  ;;  %v1288_v5 = vpack.c.bf16 %v89_v60, %v85_v55  ;;  %v84_v6 = vld [vmem:[%s2414_s4 + $0x90] sm:$0xff]  ;;  %v1310_v10 = vpack.c.bf16 %v643_v63, %v641_v62 }
  0x23   :  { %507 = vmatprep.mubr.f32.mxu0 %v1585_v0  ;;  %v1849_v3 = vld [vmem:[%s2411_s1 + $0x8] sm:$0xff]  ;;  %v88_v7 = vld [vmem:[%s2414_s4 + $0xb0] sm:$0xff]  ;;  %v93_v8 = vld [vmem:[%s2414_s4 + $0xd8] sm:$0xff]  ;;  %1307 = vmatpush1.bf16.msra.mxu0 %v1306_v57  ;;  %v1312_v12 = vpack.c.bf16 %v648_v2, %v646_v1 }
  0x24   :  { %1279 = vmatpush1.bf16.msra.mxu1 %v1278_v39  ;;  %v97_v11 = vld [vmem:[%s2414_s4 + $0xf8] sm:$0xff]  ;;  %1309 = vmatprep.subr.bf16.mxu0 %v1308_v61  ;;  %v645_v15 = vld [vmem:[%s2417_s7 + $0x40] sm:$0xff]  ;;  %v647_v16 = vld [vmem:[%s2417_s7 + $0x50] sm:$0xff]  ;;  %v1290_v19 = vpack.c.bf16 %v88_v7, %v84_v6 }
  0x25   :  { %1281 = vmatprep.subr.bf16.mxu1 %v1280_v40  ;;  %v650_v17 = vld [vmem:[%s2417_s7 + $0x68] sm:$0xff]  ;;  %v652_v18 = vld [vmem:[%s2417_s7 + $0x78] sm:$0xff]  ;;  %v1292_v20 = vpack.c.bf16 %v97_v11, %v93_v8  ;;  %v92_v21 = vld [vmem:[%s2414_s4 + $0xd0] sm:$0xff]  ;;  %v1314_v23 = vpack.c.bf16 %v647_v16, %v645_v15 }
  0x26   :  { %1222 = vmatmul.mubr.msk.f32.gmra.mrb[2].mxu0 %vm430_vm1, %v1790_v44  ;;  %v96_v22 = vld [vmem:[%s2414_s4 + $0xf0] sm:$0xff]  ;;  %v1316_v24 = vpack.c.bf16 %v652_v18, %v650_v17  ;;  %v649_v25 = vld [vmem:[%s2417_s7 + $0x60] sm:$0xff]  ;;  %v654_v27 = vld [vmem:[%s2417_s7 + $0x88] sm:$0xff] }
  0x27   :  { %1213 = vmatmul.mubr.msk.f32.vlgmr.msra.gmra.mrb[0].mxu1 %vm98_vm2, %v1785_v43  ;;  %1311 = vmatpush1.bf16.msra.mxu0 %v1310_v10  ;;  %v651_v26 = vld [vmem:[%s2417_s7 + $0x70] sm:$0xff]  ;;  %v656_v28 = vld [vmem:[%s2417_s7 + $0x98] sm:$0xff]  ;;  %v1294_v29 = vpack.c.bf16 %v96_v22, %v92_v21  ;;  %v653_v34 = vld [vmem:[%s2417_s7 + $0x80] sm:$0xff] }
  0x28   :  { %1283 = vmatpush1.bf16.msra.mxu1 %v1282_v50  ;;  %175 = vmatprep.mubr.f32.mxu1 %v1585_v0  ;;  %v425_v30 = vld [vmem:[%s2415_s5 + $0x18] sm:$0xff]  ;;  %v1318_v31 = vpack.c.bf16 %v651_v26, %v649_v25  ;;  %v1320_v33 = vpack.c.bf16 %v656_v28, %v654_v27  ;;  %v655_v35 = vld [vmem:[%s2417_s7 + $0x90] sm:$0xff]  ;;  %v658_v36 = vld [vmem:[%s2417_s7 + $0xa8] sm:$0xff] }
  0x29   :  { %1285 = vmatprep.subr.bf16.mxu1 %v1284_v54  ;;  %1313 = vmatprep.subr.bf16.mxu0 %v1312_v12  ;;  %v429_v32 = vld [vmem:[%s2415_s5 + $0x38] sm:$0xff]  ;;  %v1322_v40 = vpack.c.bf16 %v655_v35, %v653_v34  ;;  %v657_v42 = vld [vmem:[%s2417_s7 + $0xa0] sm:$0xff]  ;;  %v659_v45 = vld [vmem:[%s2417_s7 + $0xb0] sm:$0xff] }
  0x2a   :  { %v660_v37 = vld [vmem:[%s2417_s7 + $0xb8] sm:$0xff]  ;;  %v1300_v39 = vpack.c.bf16 %v429_v32, %v425_v30  ;;  %v1326_v47 = vpack.c.bf16 %v659_v45, %v657_v42  ;;  %v663_v49 = vld [vmem:[%s2417_s7 + $0xd0] sm:$0xff]  ;;  %v665_v55 = vld [vmem:[%s2417_s7 + $0xe0] sm:$0xff] }
  0x2b   :  { %1214 = vmatmul.mubr.msk.f32.gmra.mrb[2].mxu1 %vm98_vm2, %v1849_v3  ;;  %1315 = vmatpush1.bf16.msra.mxu0 %v1314_v23  ;;  %v1324_v41 = vpack.c.bf16 %v660_v37, %v658_v36  ;;  %v664_v46 = vld [vmem:[%s2417_s7 + $0xd8] sm:$0xff]  ;;  %v424_v51 = vld [vmem:[%s2415_s5 + $0x10] sm:$0xff]  ;;  %v670_v57 = vld [vmem:[%s2417_s7 + $0x108] sm:$0xff] }
  0x2c   :  { %1287 = vmatpush1.bf16.msra.mxu1 %v1286_v4  ;;  %246 = vmatprep.mubr.f32.mxu1 %v1585_v0  ;;  %v668_v50 = vld [vmem:[%s2417_s7 + $0xf8] sm:$0xff]  ;;  %v428_v52 = vld [vmem:[%s2415_s5 + $0x30] sm:$0xff]  ;;  %v669_v62 = vld [vmem:[%s2417_s7 + $0x100] sm:$0xff] }
  0x2d   :  { %1289 = vmatprep.subr.bf16.mxu1 %v1288_v5  ;;  %1317 = vmatprep.subr.bf16.mxu0 %v1316_v24  ;;  %v667_v56 = vld [vmem:[%s2417_s7 + $0xf0] sm:$0xff]  ;;  %v672_v58 = vld [vmem:[%s2417_s7 + $0x118] sm:$0xff]  ;;  %v1302_v59 = vpack.c.bf16 %v428_v52, %v424_v51  ;;  %v674_v1 = vld [vmem:[%s2417_s7 + $0x128] sm:$0xff] }
  0x2e   :  { %v1334_v60 = vpack.c.bf16 %v667_v56, %v665_v55  ;;  %v1336_v61 = vpack.c.bf16 %v672_v58, %v670_v57  ;;  %v671_v63 = vld [vmem:[%s2417_s7 + $0x110] sm:$0xff]  ;;  %v676_v2 = vld [vmem:[%s2417_s7 + $0x138] sm:$0xff]  ;;  %v673_v5 = vld [vmem:[%s2417_s7 + $0x120] sm:$0xff] }
  0x2f   :  { %1319 = vmatpush1.bf16.msra.mxu0 %v1318_v31  ;;  %v1340_v4 = vpack.c.bf16 %v676_v2, %v674_v1  ;;  %v678_v6 = vld [vmem:[%s2417_s7 + $0x148] sm:$0xff]  ;;  %v680_v7 = vld [vmem:[%s2417_s7 + $0x158] sm:$0xff]  ;;  %v677_v11 = vld [vmem:[%s2417_s7 + $0x140] sm:$0xff] }
  0x30   :  { %1291 = vmatpush1.bf16.msra.mxu1 %v1290_v19  ;;  %1321 = vmatprep.subr.bf16.mxu0 %v1320_v33  ;;  %v1344_v10 = vpack.c.bf16 %v680_v7, %v678_v6  ;;  %v682_v12 = vld [vmem:[%s2417_s7 + $0x168] sm:$0xff]  ;;  %v681_v17 = vld [vmem:[%s2417_s7 + $0x160] sm:$0xff]  ;;  %v688_v19 = vld [vmem:[%s2417_s7 + $0x198] sm:$0xff] }
  0x31   :  { %1293 = vmatprep.subr.bf16.mxu1 %v1292_v20  ;;  %v686_v18 = vld [vmem:[%s2417_s7 + $0x188] sm:$0xff]  ;;  %v685_v22 = vld [vmem:[%s2417_s7 + $0x180] sm:$0xff]  ;;  %v687_v23 = vld [vmem:[%s2417_s7 + $0x190] sm:$0xff] }
  0x32   :  { %v1352_v21 = vpack.c.bf16 %v688_v19, %v686_v18  ;;  %v1354_v24 = vpack.c.bf16 %v687_v23, %v685_v22  ;;  %v690_v25 = vld [vmem:[%s2417_s7 + $0x1a8] sm:$0xff]  ;;  %v692_v26 = vld [vmem:[%s2417_s7 + $0x1b8] sm:$0xff]  ;;  %v689_v28 = vld [vmem:[%s2417_s7 + $0x1a0] sm:$0xff] }
  0x33   :  { %1323 = vmatpush1.bf16.msra.mxu0 %v1322_v40  ;;  %v1356_v27 = vpack.c.bf16 %v692_v26, %v690_v25  ;;  %v694_v31 = vld [vmem:[%s2417_s7 + $0x1c8] sm:$0xff]  ;;  %v696_v32 = vld [vmem:[%s2417_s7 + $0x1d8] sm:$0xff]  ;;  %v693_v34 = vld [vmem:[%s2417_s7 + $0x1c0] sm:$0xff] }
  0x34   :  { %1295 = vmatpush1.bf16.msra.mxu1 %v1294_v29  ;;  %1325 = vmatprep.subr.bf16.mxu0 %v1324_v41  ;;  %v691_v29 = vld [vmem:[%s2417_s7 + $0x1b0] sm:$0xff]  ;;  %v1360_v33 = vpack.c.bf16 %v696_v32, %v694_v31  ;;  %v698_v37 = vld [vmem:[%s2417_s7 + $0x1e8] sm:$0xff]  ;;  %v697_v41 = vld [vmem:[%s2417_s7 + $0x1e0] sm:$0xff] }
  0x35   :  { %1528 = vmatprep.subr.mxu1 %v1694_v9  ;;  %v662_v9 = vld [vmem:[%s2417_s7 + $0xc8] sm:$0xff]  ;;  %v1358_v30 = vpack.c.bf16 %v691_v29, %v689_v28  ;;  %v695_v35 = vld [vmem:[%s2417_s7 + $0x1d0] sm:$0xff]  ;;  %v938_v52 = vld [vmem:[#allocation2 + $0x18] sm:$0xff] }
  0x36   :  { %v1328_v48 = vpack.c.bf16 %v664_v46, %v662_v9  ;;  %v1362_v36 = vpack.c.bf16 %v695_v35, %v693_v34  ;;  %v699_v42 = vld [vmem:[%s2417_s7 + $0x1f0] sm:$0xff]  ;;  %v702_v9 = vld [vmem:[%s2417_s7 + $0x208] sm:$0xff]  ;;  %v704_v46 = vld [vmem:[%s2417_s7 + $0x218] sm:$0xff] }
  0x37   :  { %1215 = vmatmul.mubr.msk.f32.vlgmr.msra.gmra.mrb[4].mxu1 %vm98_vm2, %v1785_v43  ;;  %v661_v43 = vld [vmem:[%s2417_s7 + $0xc0] sm:$0xff]  ;;  %1327 = vmatpush1.bf16.msra.mxu0 %v1326_v47  ;;  %v1366_v45 = vpack.c.bf16 %v699_v42, %v697_v41  ;;  %v1368_v47 = vpack.c.bf16 %v704_v46, %v702_v9  ;;  %v936_v51 = vld [vmem:[#allocation2 + $0x8] sm:$0xff]  ;;  %v937_v55 = vld [vmem:[#allocation2 + $0x10] sm:$0xff] }
  0x38   :  { %252 = vmatprep.mubr.f32.mxu1 %v1585_v0  ;;  %1529 = vmatpush1.msra.mxu1 %v1712_v14  ;;  %v666_v14 = vld [vmem:[%s2417_s7 + $0xe8] sm:$0xff]  ;;  %v1330_v53 = vpack.c.bf16 %v663_v49, %v661_v43  ;;  %v942_v57 = vld [vmem:[#allocation2 + $0x38] sm:$0xff]  ;;  %v959_v26 = vld [vmem:[#allocation2 + $0xc0] sm:$0xff] }
  0x39   :  { %1301 = vmatprep.subr.bf16.mxu1 %v1300_v39  ;;  %1329 = vmatprep.subr.bf16.mxu0 %v1328_v48  ;;  %v1332_v54 = vpack.c.bf16 %v668_v50, %v666_v14  ;;  %v700_v39 = vld [vmem:[%s2417_s7 + $0x1f8] sm:$0xff]  ;;  %v601_v48 = vlaneseq  ;;  %v2074_v14 = vld [vmem:[%s2416_s6] sm:$0xf]  ;;  %v940_v56 = vld [vmem:[#allocation2 + $0x28] sm:$0xff] }
  0x3a   :  { %v1364_v40 = vpack.c.bf16 %v700_v39, %v698_v37  ;;  %v960_v22 = vld [vmem:[#allocation2 + $0xc8] sm:$0xff]  ;;  %v962_v23 = vld [vmem:[#allocation2 + $0xd8] sm:$0xff]  ;;  %v963_v32 = vld [vmem:[#allocation2 + $0xe0] sm:$0xff] }
  0x3b   :  { %1216 = vmatmul.mubr.msk.f32.gmra.mrb[6].mxu1 %vm98_vm2, %v1849_v3  ;;  %1331 = vmatpush1.bf16.msra.mxu0 %v1330_v53  ;;  %v1338_v3 = vpack.c.bf16 %v671_v63, %v669_v62  ;;  %v2068_v43 = vshrl.u32 %v601_v48, 7  ;;  %v935_v53 = vld [vmem:[#allocation2] sm:$0xff]  ;;  %v944_v62 = vld [vmem:[#allocation2 + $0x48] sm:$0xff]  ;;  %v946_v63 = vld [vmem:[#allocation2 + $0x58] sm:$0xff]  ;;  %v1456_v25 = vpack.c.bf16 %v962_v23, %v960_v22 }
  0x3c   :  { %413 = vmatprep.mubr.f32.mxu1 %v1585_v0  ;;  %1333 = vmatprep.subr.bf16.mxu0 %v1332_v54  ;;  %v1432_v54 = vpack.c.bf16 %v938_v52, %v936_v51  ;;  %v1434_v58 = vpack.c.bf16 %v937_v55, %v935_v53  ;;  %v1440_v2 = vpack.c.bf16 %v946_v63, %v944_v62  ;;  %v964_v28 = vld [vmem:[#allocation2 + $0xe8] sm:$0xff]  ;;  %v966_v29 = vld [vmem:[#allocation2 + $0xf8] sm:$0xff]  ;;  %v967_v39 = vld [vmem:[#allocation2 + $0x100] sm:$0xff] }
  0x3d   :  { %v611_v49 = vsub.s32 2, %v2068_v43  ;;  %v1460_v31 = vpack.c.bf16 %v966_v29, %v964_v28  ;;  %v968_v34 = vld [vmem:[#allocation2 + $0x108] sm:$0xff]  ;;  %v970_v35 = vld [vmem:[#allocation2 + $0x118] sm:$0xff]  ;;  %v971_v46 = vld [vmem:[#allocation2 + $0x120] sm:$0xff] }
  0x3e   :  { %v1464_v37 = vpack.c.bf16 %v970_v35, %v968_v34  ;;  %v972_v41 = vld [vmem:[#allocation2 + $0x128] sm:$0xff]  ;;  %v974_v42 = vld [vmem:[#allocation2 + $0x138] sm:$0xff]  ;;  %v975_v53 = vld [vmem:[#allocation2 + $0x140] sm:$0xff] }
  0x3f   :  { %1335 = vmatpush1.bf16.msra.mxu0 %v1334_v60  ;;  %v2077_v50 = vrot.slane %v2074_v14, %v611_v49  ;;  %v939_v60 = vld [vmem:[#allocation2 + $0x20] sm:$0xff]  ;;  %v1468_v9 = vpack.c.bf16 %v974_v42, %v972_v41  ;;  %v976_v48 = vld [vmem:[#allocation2 + $0x148] sm:$0xff]  ;;  %v978_v49 = vld [vmem:[#allocation2 + $0x158] sm:$0xff] }
  0x40   :  { %1337 = vmatprep.subr.bf16.mxu0 %v1336_v61  ;;  %v941_v61 = vld [vmem:[#allocation2 + $0x30] sm:$0xff]  ;;  %v1472_v52 = vpack.c.bf16 %v978_v49, %v976_v48  ;;  %v980_v55 = vld [vmem:[#allocation2 + $0x168] sm:$0xff]  ;;  %v986_v63 = vld [vmem:[#allocation2 + $0x198] sm:$0xff] }
  0x41   :  { %v1438_v1 = vpack.c.bf16 %v941_v61, %v939_v60  ;;  %v981_v60 = vld [vmem:[#allocation2 + $0x170] sm:$0xff]  ;;  %v984_v62 = vld [vmem:[#allocation2 + $0x188] sm:$0xff]  ;;  %v701_v28 = vld [vmem:[%s2417_s7 + $0x200] sm:$0xff] }
  0x42   :  { %v703_v29 = vld [vmem:[%s2417_s7 + $0x210] sm:$0xff]  ;;  %v712_v48 = vld [vmem:[%s2417_s7 + $0x258] sm:$0xff] }
  0x43   :  { %1220 = vmatmul.mubr.msk.f32.vlgmr.msra.gmra.mrb[6].mxu1 %vm259_vm0, %v1707_v13  ;;  %v675_v13 = vld [vmem:[%s2417_s7 + $0x130] sm:$0xff]  ;;  %1339 = vmatpush1.bf16.msra.mxu0 %v1338_v3  ;;  %v943_v3 = vld [vmem:[#allocation2 + $0x40] sm:$0xff] }
  0x44   :  { %1303 = vmatpush1.bf16.msra.mxu1 %v1302_v59  ;;  %578 = vmatprep.mubr.f32.mxu1 %v1585_v0  ;;  %v1342_v8 = vpack.c.bf16 %v675_v13, %v673_v5  ;;  %v1436_v59 = vpack.c.bf16 %v942_v57, %v940_v56  ;;  %v948_v5 = vld [vmem:[#allocation2 + $0x68] sm:$0xff]  ;;  %v950_v13 = vld [vmem:[#allocation2 + $0x78] sm:$0xff] }
  0x45   :  { %1341 = vmatprep.subr.bf16.mxu0 %v1340_v4  ;;  %1433 = vmatprep.subr.bf16.mxu1 %v1432_v54  ;;  %v945_v4 = vld [vmem:[#allocation2 + $0x50] sm:$0xff]  ;;  %v1444_v7 = vpack.c.bf16 %v950_v13, %v948_v5  ;;  %v982_v56 = vld [vmem:[#allocation2 + $0x178] sm:$0xff] }
  0x46   :  { %v1442_v6 = vpack.c.bf16 %v945_v4, %v943_v3  ;;  %v977_v54 = vld [vmem:[#allocation2 + $0x150] sm:$0xff]  ;;  %v1480_v3 = vpack.c.bf16 %v986_v63, %v984_v62  ;;  %v983_v4 = vld [vmem:[#allocation2 + $0x180] sm:$0xff] }
  0x47   :  { %1223 = vmatmul.mubr.msk.f32.vlgmr.msra.gmra.mrb[8].mxu1 %vm430_vm1, %v1772_v38  ;;  %v679_v38 = vld [vmem:[%s2417_s7 + $0x150] sm:$0xff]  ;;  %1343 = vmatpush1.bf16.msra.mxu0 %v1342_v8  ;;  %v947_v8 = vld [vmem:[#allocation2 + $0x60] sm:$0xff]  ;;  %v1474_v57 = vpack.c.bf16 %v977_v54, %v975_v53 }
  0x48   :  { %584 = vmatprep.mubr.f32.mxu1 %v1585_v0  ;;  %v684_v0 = vld [vmem:[%s2417_s7 + $0x178] sm:$0xff]  ;;  %v1346_v15 = vpack.c.bf16 %v679_v38, %v677_v11  ;;  %1345 = vmatprep.subr.bf16.mxu0 %v1344_v10  ;;  %v949_v10 = vld [vmem:[#allocation2 + $0x70] sm:$0xff]  ;;  %v952_v11 = vld [vmem:[#allocation2 + $0x88] sm:$0xff] }
  0x49   :  { %v1348_v16 = vpack.c.bf16 %v684_v0, %v682_v12  ;;  %1435 = vmatpush1.bf16.msra.mxu1 %v1434_v58  ;;  %v954_v38 = vld [vmem:[#allocation2 + $0x98] sm:$0xff]  ;;  %v1446_v12 = vpack.c.bf16 %v949_v10, %v947_v8  ;;  %v1476_v58 = vpack.c.bf16 %v982_v56, %v980_v55  ;;  %v985_v5 = vld [vmem:[#allocation2 + $0x190] sm:$0xff]  ;;  %v709_v54 = vld [vmem:[%s2417_s7 + $0x240] sm:$0xff] }
  0x4a   :  { %1437 = vmatprep.subr.bf16.mxu1 %v1436_v59  ;;  %v1448_v0 = vpack.c.bf16 %v954_v38, %v952_v11  ;;  %v979_v59 = vld [vmem:[#allocation2 + $0x160] sm:$0xff]  ;;  %v990_v8 = vld [vmem:[#allocation2 + $0x1b8] sm:$0xff]  ;;  %v2087_v11 = vsub.s32 1, %v2068_v43  ;;  %v1482_v38 = vpack.c.bf16 %v985_v5, %v983_v4  ;;  %v711_v55 = vld [vmem:[%s2417_s7 + $0x250] sm:$0xff] }
  0x4b   :  { %1224 = vmatmul.mubr.msk.f32.gmra.mrb[6].mxu1 %vm430_vm1, %v1790_v44  ;;  %v683_v44 = vld [vmem:[%s2417_s7 + $0x170] sm:$0xff]  ;;  %1347 = vmatpush1.bf16.msra.mxu0 %v1346_v15  ;;  %v951_v15 = vld [vmem:[#allocation2 + $0x80] sm:$0xff]  ;;  %v714_v56 = vld [vmem:[%s2417_s7 + $0x268] sm:$0xff] }
  0x4c   :  { %v1350_v20 = vpack.c.bf16 %v683_v44, %v681_v17  ;;  %1349 = vmatprep.subr.bf16.mxu0 %v1348_v16  ;;  %v953_v16 = vld [vmem:[#allocation2 + $0x90] sm:$0xff]  ;;  %v956_v17 = vld [vmem:[#allocation2 + $0xa8] sm:$0xff]  ;;  %v958_v44 = vld [vmem:[#allocation2 + $0xb8] sm:$0xff] }
  0x4d   :  { %1439 = vmatpush1.bf16.msra.mxu1 %v1438_v1  ;;  %v1450_v18 = vpack.c.bf16 %v953_v16, %v951_v15  ;;  %v1452_v19 = vpack.c.bf16 %v958_v44, %v956_v17  ;;  %v989_v15 = vld [vmem:[#allocation2 + $0x1b0] sm:$0xff]  ;;  %v992_v44 = vld [vmem:[#allocation2 + $0x1c8] sm:$0xff] }
  0x4e   :  { %1441 = vmatprep.subr.bf16.mxu1 %v1440_v2  ;;  %v1478_v2 = vpack.c.bf16 %v981_v60, %v979_v59  ;;  %v713_v60 = vld [vmem:[%s2417_s7 + $0x260] sm:$0xff]  ;;  %v715_v62 = vld [vmem:[%s2417_s7 + $0x270] sm:$0xff] }
  0x4f   :  { %1351 = vmatpush1.bf16.msra.mxu0 %v1350_v20  ;;  %v955_v20 = vld [vmem:[#allocation2 + $0xa0] sm:$0xff] }
  0x50   :  { %1353 = vmatprep.subr.bf16.mxu0 %v1352_v21  ;;  %v957_v21 = vld [vmem:[#allocation2 + $0xb0] sm:$0xff] }
  0x51   :  { %1443 = vmatpush1.bf16.msra.mxu1 %v1442_v6  ;;  %v2084_v6 = vsub.s32 0, %v2068_v43 }
  0x52   :  { %1445 = vmatprep.subr.bf16.mxu1 %v1444_v7  ;;  %v988_v7 = vld [vmem:[#allocation2 + $0x1a8] sm:$0xff] }
  0x53   :  { %1355 = vmatpush1.bf16.msra.mxu0 %v1354_v24  ;;  %v1454_v24 = vpack.c.bf16 %v957_v21, %v955_v20  ;;  %v604_v16 = vrot.slane %v2074_v14, %v2084_v6  ;;  %v608_v20 = vrot.slane %v2074_v14, %v2087_v11 }
  0x54   :  { %1357 = vmatprep.subr.bf16.mxu0 %v1356_v27  ;;  %v961_v27 = vld [vmem:[#allocation2 + $0xd0] sm:$0xff] }
  0x55   :  { %1447 = vmatpush1.bf16.msra.mxu1 %v1446_v12  ;;  %v1484_v12 = vpack.c.bf16 %v990_v8, %v988_v7  ;;  %v1382_v7 = vpack.c.bf16 %v715_v62, %v713_v60 }
  0x56   :  { %1449 = vmatprep.subr.bf16.mxu1 %v1448_v0  ;;  %v987_v0 = vld [vmem:[#allocation2 + $0x1a0] sm:$0xff] }
  0x57   :  { %1359 = vmatpush1.bf16.msra.mxu0 %v1358_v30  ;;  %v1458_v30 = vpack.c.bf16 %v961_v27, %v959_v26 }
  0x58   :  { %1361 = vmatprep.subr.bf16.mxu0 %v1360_v33  ;;  %v965_v33 = vld [vmem:[#allocation2 + $0xf0] sm:$0xff] }
  0x59   :  { %1451 = vmatpush1.bf16.msra.mxu1 %v1450_v18  ;;  %v994_v18 = vld [vmem:[#allocation2 + $0x1d8] sm:$0xff] }
  0x5a   :  { %1453 = vmatprep.subr.bf16.mxu1 %v1452_v19  ;;  %v1488_v26 = vpack.c.bf16 %v994_v18, %v992_v44  ;;  %v728_v44 = vld [vmem:[%s2417_s7 + $0x2d8] sm:$0xff] }
  0x5b   :  { %1363 = vmatpush1.bf16.msra.mxu0 %v1362_v36  ;;  %v1462_v36 = vpack.c.bf16 %v965_v33, %v963_v32  ;;  %v706_v32 = vld [vmem:[%s2417_s7 + $0x228] sm:$0xff]  ;;  %v708_v33 = vld [vmem:[%s2417_s7 + $0x238] sm:$0xff] }
  0x5c   :  { %1365 = vmatprep.subr.bf16.mxu0 %v1364_v40  ;;  %v969_v40 = vld [vmem:[#allocation2 + $0x110] sm:$0xff]  ;;  %v1372_v42 = vpack.c.bf16 %v708_v33, %v706_v32 }
  0x5d   :  { %1455 = vmatpush1.bf16.msra.mxu1 %v1454_v24  ;;  %v1486_v24 = vpack.c.bf16 %v989_v15, %v987_v0  ;;  %v721_v15 = vld [vmem:[%s2417_s7 + $0x2a0] sm:$0xff] }
  0x5e   :  { %1457 = vmatprep.subr.bf16.mxu1 %v1456_v25 }
  0x5f   :  { %1367 = vmatpush1.bf16.msra.mxu0 %v1366_v45  ;;  %v1466_v45 = vpack.c.bf16 %v969_v40, %v967_v39  ;;  %v1370_v39 = vpack.c.bf16 %v703_v29, %v701_v28 }
  0x60   :  { %1369 = vmatprep.subr.bf16.mxu0 %v1368_v47  ;;  %v973_v47 = vld [vmem:[#allocation2 + $0x130] sm:$0xff] }
  0x61   :  { %1459 = vmatpush1.bf16.msra.mxu1 %v1458_v30  ;;  %v1470_v51 = vpack.c.bf16 %v973_v47, %v971_v46  ;;  %v710_v47 = vld [vmem:[%s2417_s7 + $0x248] sm:$0xff] }
  0x62   :  { %1461 = vmatprep.subr.bf16.mxu1 %v1460_v31  ;;  %v1376_v53 = vpack.c.bf16 %v712_v48, %v710_v47 }
  0x65   :  { %1463 = vmatpush1.bf16.msra.mxu1 %v1462_v36 }
  0x66   :  { %1465 = vmatprep.subr.bf16.mxu1 %v1464_v37 }
  0x69   :  { %1467 = vmatpush1.bf16.msra.mxu1 %v1466_v45  ;;  %v705_v45 = vld [vmem:[%s2417_s7 + $0x220] sm:$0xff] }
  0x6a   :  { %1469 = vmatprep.subr.bf16.mxu1 %v1468_v9  ;;  %v707_v9 = vld [vmem:[%s2417_s7 + $0x230] sm:$0xff] }
  0x6d   :  { %1471 = vmatpush1.bf16.msra.mxu1 %v1470_v51  ;;  %v1374_v51 = vpack.c.bf16 %v707_v9, %v705_v45 }
  0x6e   :  { %1473 = vmatprep.subr.bf16.mxu1 %v1472_v52 }
  0x71   :  { %1475 = vmatpush1.bf16.msra.mxu1 %v1474_v57  ;;  %v716_v57 = vld [vmem:[%s2417_s7 + $0x278] sm:$0xff] }
  0x72   :  { %1477 = vmatprep.subr.bf16.mxu1 %v1476_v58  ;;  %v1378_v58 = vpack.c.bf16 %v711_v55, %v709_v54  ;;  %v1380_v59 = vpack.c.bf16 %v716_v57, %v714_v56  ;;  %v741_v56 = vld [vmem:[%s2417_s7 + $0x340] sm:$0xff]  ;;  %v743_v57 = vld [vmem:[%s2417_s7 + $0x350] sm:$0xff] }
  0x73   :  { %v1410_v60 = vpack.c.bf16 %v743_v57, %v741_v56 }
  0x75   :  { %1479 = vmatpush1.bf16.msra.mxu1 %v1478_v2  ;;  %v718_v2 = vld [vmem:[%s2417_s7 + $0x288] sm:$0xff] }
  0x76   :  { %1481 = vmatprep.subr.bf16.mxu1 %v1480_v3  ;;  %v720_v3 = vld [vmem:[%s2417_s7 + $0x298] sm:$0xff] }
  0x77   :  { %v1384_v8 = vpack.c.bf16 %v720_v3, %v718_v2  ;;  %v747_v2 = vld [vmem:[%s2417_s7 + $0x370] sm:$0xff]  ;;  %v750_v3 = vld [vmem:[%s2417_s7 + $0x388] sm:$0xff] }
  0x79   :  { %1483 = vmatpush1.bf16.msra.mxu1 %v1482_v38  ;;  %v719_v38 = vld [vmem:[%s2417_s7 + $0x290] sm:$0xff] }
  0x7a   :  { %1485 = vmatprep.subr.bf16.mxu1 %v1484_v12  ;;  %v722_v12 = vld [vmem:[%s2417_s7 + $0x2a8] sm:$0xff] }
  0x7d   :  { %1487 = vmatpush1.bf16.msra.mxu1 %v1486_v24  ;;  %v732_v24 = vld [vmem:[%s2417_s7 + $0x2f8] sm:$0xff] }
  0x7e   :  { %1489 = vmatprep.subr.bf16.mxu1 %v1488_v26 }
  0xf1   :  { %v2079_v61 = vpop.f32.mrb[4].mxu0 }
  0xf2   :  { %v2081_v1 = vpop.f32.mrb[5].mxu0 }
  0xf5   :  { %v503_v13 = vpop.f32.mrb[0].mxu0 }
  0xf6   :  { %v505_v10 = vpop.f32.mrb[1].mxu0 }
  0xf9   :  { %v509_v17 = vpop.f32.mrb[2].mxu0 }
  0xfa   :  { %v171_v19 = vpop.f32.mrb[0].mxu1  ;;  %v511_v21 = vpop.f32.mrb[3].mxu0 }
  0xfb   :  { %v1530_v22 = vadd.f32 %v503_v13, %v171_v19  ;;  %v173_v23 = vpop.f32.mrb[1].mxu1 }
  0xfc   :  { %v1531_v25 = vadd.f32 %v505_v10, %v173_v23  ;;  %v717_v10 = vld [vmem:[%s2417_s7 + $0x280] sm:$0xff]  ;;  %v730_v23 = vld [vmem:[%s2417_s7 + $0x2e8] sm:$0xff] }
  0xfd   :  { %v621_v27 = vadd.f32 %v1530_v22, %v604_v16  ;;  %v615_v22 = vsub.s32 3, %v2068_v43  ;;  %v1396_v26 = vpack.c.bf16 %v732_v24, %v730_v23  ;;  %v731_v43 = vld [vmem:[%s2417_s7 + $0x2f0] sm:$0xff]  ;;  %v761_v24 = vld [vmem:[%s2417_s7 + $0x3e0] sm:$0xff] }
  0xfe   :  { %v622_v30 = vadd.f32 %v1531_v25, %v608_v20  ;;  %v177_v31 = vpop.f32.mrb[2].mxu1 }
  0xff   :  { %v1532_v34 = vadd.f32 %v509_v17, %v177_v31  ;;  %v179_v35 = vpop.f32.mrb[3].mxu1  ;;  %v629_v40 = vmax.f32 %v621_v27, 0.0  ;;  %v726_v17 = vld [vmem:[%s2417_s7 + $0x2c8] sm:$0xff]  ;;  %v729_v27 = vld [vmem:[%s2417_s7 + $0x2e0] sm:$0xff]  ;;  %v2187_v29 = vrot.slane %v2074_v14, %v615_v22  ;;  %v736_v31 = vld [vmem:[%s2417_s7 + $0x318] sm:$0xff] }
 0x100   :  { %v630_v36 = vmax.f32 %v622_v30, 0.0  ;;  %v1533_v37 = vadd.f32 %v511_v21, %v179_v35  ;;  %v1392_v19 = vpack.c.bf16 %v728_v44, %v726_v17  ;;  %v727_v21 = vld [vmem:[%s2417_s7 + $0x2d0] sm:$0xff]  ;;  %v734_v30 = vld [vmem:[%s2417_s7 + $0x308] sm:$0xff]  ;;  %v1398_v35 = vpack.c.bf16 %v731_v43, %v729_v27  ;;  %v733_v14 = vld [vmem:[%s2417_s7 + $0x300] sm:$0xff] }
 0x101   :  { %v625_v41 = vadd.f32 %v1532_v34, %v604_v16  ;;  %v723_v16 = vld [vmem:[%s2417_s7 + $0x2b0] sm:$0xff] }
 0x102   :  { %v626_v46 = vadd.f32 %v1533_v37, %v608_v20  ;;  %841 = vmatprep.mubr.f32.mxu0 %v630_v36  ;;  %v1390_v18 = vpack.c.bf16 %v723_v16, %v721_v15  ;;  %v725_v20 = vld [vmem:[%s2417_s7 + $0x2c0] sm:$0xff]  ;;  %v1400_v37 = vpack.c.bf16 %v736_v31, %v734_v30  ;;  %v758_v15 = vld [vmem:[%s2417_s7 + $0x3c8] sm:$0xff]  ;;  %v760_v16 = vld [vmem:[%s2417_s7 + $0x3d8] sm:$0xff] }
 0x103   :  { %842 = vmatmul.mubr.f32.vlgmr.msra.gmra.mrb[6].mxu0 %v629_v40  ;;  %v633_v52 = vmax.f32 %v625_v41, 0.0  ;;  %v1394_v25 = vpack.c.bf16 %v727_v21, %v725_v20  ;;  %v738_v41 = vld [vmem:[%s2417_s7 + $0x328] sm:$0xff]  ;;  %v1424_v44 = vpack.c.bf16 %v760_v16, %v758_v15  ;;  %v764_v21 = vld [vmem:[%s2417_s7 + $0x3f8] sm:$0xff]  ;;  %v991_v31 = vld [vmem:[#allocation2 + $0x1c0] sm:$0xff] }
 0x104   :  { %v634_v49 = vmax.f32 %v626_v46, 0.0  ;;  %1371 = vmatpush1.bf16.msra.mxu0 %v1370_v39  ;;  %v735_v39 = vld [vmem:[%s2417_s7 + $0x310] sm:$0xff]  ;;  %v762_v20 = vld [vmem:[%s2417_s7 + $0x3e8] sm:$0xff]  ;;  %v1099_v16 = vld [vmem:[%s2421_s11 + $0x38] sm:$0xff] }
 0x105   :  { %1373 = vmatprep.subr.bf16.mxu0 %v1372_v42  ;;  %v740_v42 = vld [vmem:[%s2417_s7 + $0x338] sm:$0xff]  ;;  %v1402_v48 = vpack.c.bf16 %v735_v39, %v733_v14  ;;  %v1428_v23 = vpack.c.bf16 %v764_v21, %v762_v20  ;;  %v995_v14 = vld [vmem:[#allocation2 + $0x1e0] sm:$0xff]  ;;  %v997_v39 = vld [vmem:[#allocation2 + $0x1f0] sm:$0xff] }
 0x106   :  { %847 = vmatprep.mubr.f32.mxu0 %v634_v49  ;;  %v1404_v49 = vpack.c.bf16 %v740_v42, %v738_v41  ;;  %v765_v42 = vld [vmem:[%s2418_s8] sm:$0x3]  ;;  %v1098_v15 = vld [vmem:[%s2421_s11 + $0x30] sm:$0xff]  ;;  %v1101_v21 = vld [vmem:[%s2421_s11 + $0x48] sm:$0xff] }
 0x107   :  { %848 = vmatmul.mubr.f32.gmra.mrb[8].mxu0 %v633_v52  ;;  %v739_v52 = vld [vmem:[%s2417_s7 + $0x330] sm:$0xff]  ;;  %v1100_v20 = vld [vmem:[%s2421_s11 + $0x40] sm:$0xff] }
 0x108   :  { %1375 = vmatpush1.bf16.msra.mxu0 %v1374_v51  ;;  %v737_v51 = vld [vmem:[%s2417_s7 + $0x320] sm:$0xff] }
 0x109   :  { %1377 = vmatprep.subr.bf16.mxu0 %v1376_v53  ;;  %v744_v53 = vld [vmem:[%s2417_s7 + $0x358] sm:$0xff]  ;;  %v1406_v54 = vpack.c.bf16 %v739_v52, %v737_v51  ;;  %v1093_v51 = vld [vmem:[%s2421_s11 + $0x8] sm:$0xff] }
 0x10a   :  { %v248_v63 = vpop.f32.mrb[4].mxu1 }
 0x10b   :  { %v410_v4 = vadd.f32 %v2079_v61, %v248_v63  ;;  %v250_v5 = vpop.f32.mrb[5].mxu1  ;;  %v724_v61 = vld [vmem:[%s2417_s7 + $0x2b8] sm:$0xff]  ;;  %v745_v63 = vld [vmem:[%s2417_s7 + $0x360] sm:$0xff] }
 0x10c   :  { %v412_v13 = vadd.f32 %v2081_v1, %v250_v5  ;;  %1379 = vmatpush1.bf16.msra.mxu0 %v1378_v58  ;;  %v1386_v1 = vpack.c.bf16 %v719_v38, %v717_v10  ;;  %v1388_v0 = vpack.c.bf16 %v724_v61, %v722_v12  ;;  %v746_v58 = vld [vmem:[%s2417_s7 + $0x368] sm:$0xff]  ;;  %v1414_v5 = vpack.c.bf16 %v747_v2, %v745_v63  ;;  %v756_v38 = vld [vmem:[%s2417_s7 + $0x3b8] sm:$0xff] }
 0x10d   :  { %1381 = vmatprep.subr.bf16.mxu0 %v1380_v59  ;;  %v748_v59 = vld [vmem:[%s2417_s7 + $0x378] sm:$0xff]  ;;  %v754_v10 = vld [vmem:[%s2417_s7 + $0x3a8] sm:$0xff] }
 0x10e   :  { %v1412_v62 = vpack.c.bf16 %v748_v59, %v746_v58  ;;  %v1420_v61 = vpack.c.bf16 %v756_v38, %v754_v10  ;;  %v1095_v63 = vld [vmem:[%s2421_s11 + $0x18] sm:$0xff]  ;;  %v1096_v10 = vld [vmem:[%s2421_s11 + $0x20] sm:$0xff]  ;;  %v1097_v38 = vld [vmem:[%s2421_s11 + $0x28] sm:$0xff] }
 0x110   :  { %1383 = vmatpush1.bf16.msra.mxu0 %v1382_v7  ;;  %v749_v7 = vld [vmem:[%s2417_s7 + $0x380] sm:$0xff] }
 0x111   :  { %1385 = vmatprep.subr.bf16.mxu0 %v1384_v8  ;;  %v751_v8 = vld [vmem:[%s2417_s7 + $0x390] sm:$0xff] }
 0x112   :  { %v1418_v12 = vpack.c.bf16 %v751_v8, %v749_v7 }
 0x114   :  { %1387 = vmatpush1.bf16.msra.mxu0 %v1386_v1  ;;  %v753_v1 = vld [vmem:[%s2417_s7 + $0x3a0] sm:$0xff] }
 0x115   :  { %1389 = vmatprep.subr.bf16.mxu0 %v1388_v0  ;;  %v755_v0 = vld [vmem:[%s2417_s7 + $0x3b0] sm:$0xff] }
 0x116   :  { %v1422_v17 = vpack.c.bf16 %v755_v0, %v753_v1  ;;  %v1506_v1 = vpack.c.bf16 %v1097_v38, %v1096_v10 }
 0x118   :  { %1391 = vmatpush1.bf16.msra.mxu0 %v1390_v18  ;;  %v757_v18 = vld [vmem:[%s2417_s7 + $0x3c0] sm:$0xff] }
 0x119   :  { %1393 = vmatprep.subr.bf16.mxu0 %v1392_v19  ;;  %v759_v19 = vld [vmem:[%s2417_s7 + $0x3d0] sm:$0xff] }
 0x11a   :  { %v580_v28 = vpop.f32.mrb[8].mxu1  ;;  %v1426_v22 = vpack.c.bf16 %v759_v19, %v757_v18  ;;  %v1510_v18 = vpack.c.bf16 %v1099_v16, %v1098_v15 }
 0x11b   :  { %v593_v32 = vadd.f32 %v580_v28, %v410_v4  ;;  %v582_v33 = vpop.f32.mrb[9].mxu1  ;;  %v752_v4 = vld [vmem:[%s2417_s7 + $0x398] sm:$0xff] }
 0x11c   :  { %v594_v34 = vadd.f32 %v582_v33, %v412_v13  ;;  %1395 = vmatpush1.bf16.msra.mxu0 %v1394_v25  ;;  %v1416_v13 = vpack.c.bf16 %v752_v4, %v750_v3  ;;  %v763_v25 = vld [vmem:[%s2417_s7 + $0x3f0] sm:$0xff]  ;;  %v1112_v3 = vld [vmem:[%s2421_s11 + $0xa0] sm:$0xff]  ;;  %v1113_v4 = vld [vmem:[%s2421_s11 + $0xa8] sm:$0xff] }
 0x11d   :  { %v2196_v36 = vadd.f32 %v2077_v50, %v593_v32  ;;  %1397 = vmatprep.subr.bf16.mxu0 %v1396_v26  ;;  %v1430_v26 = vpack.c.bf16 %v763_v25, %v761_v24  ;;  %v993_v32 = vld [vmem:[#allocation2 + $0x1d0] sm:$0xff]  ;;  %v1504_v8 = vpack.c.bf16 %v1113_v4, %v1112_v3  ;;  %v1514_v24 = vpack.c.bf16 %v1101_v21, %v1100_v20 }
 0x11e   :  { %v624_v40 = vadd.f32 %v2187_v29, %v594_v34  ;;  %v586_v45 = vpop.f32.mrb[6].mxu1  ;;  %v1490_v33 = vpack.c.bf16 %v993_v32, %v991_v31  ;;  %v996_v34 = vld [vmem:[#allocation2 + $0x1e8] sm:$0xff]  ;;  %v1104_v32 = vld [vmem:[%s2421_s11 + $0x60] sm:$0xff] }
 0x11f   :  { %v2212_v9 = vadd.f32 %v2077_v50, %v586_v45  ;;  %v588_v46 = vpop.f32.mrb[7].mxu1  ;;  %v742_v50 = vld [vmem:[%s2417_s7 + $0x348] sm:$0xff]  ;;  %v631_v43 = vmax.f32 %v2196_v36, 0.0  ;;  %v770_v45 = vrot.slane %v765_v42, %v2084_v6 }
 0x120   :  { %v632_v47 = vmax.f32 %v624_v40, 0.0  ;;  %1399 = vmatpush1.bf16.msra.mxu0 %v1398_v35  ;;  %v1408_v55 = vpack.c.bf16 %v744_v53, %v742_v50  ;;  %v628_v27 = vadd.f32 %v2187_v29, %v588_v46  ;;  %1491 = vmatpush1.bf16.msra.mxu1 %v1490_v33  ;;  %v998_v35 = vld [vmem:[#allocation2 + $0x1f8] sm:$0xff]  ;;  %v1494_v40 = vpack.c.bf16 %v997_v39, %v995_v14  ;;  %v1108_v29 = vld [vmem:[%s2421_s11 + $0x80] sm:$0xff]  ;;  %v1109_v36 = vld [vmem:[%s2421_s11 + $0x88] sm:$0xff] }
 0x121   :  { %1401 = vmatprep.subr.bf16.mxu0 %v1400_v37  ;;  %v635_v30 = vmax.f32 %v2212_v9, 0.0  ;;  %v1492_v37 = vpack.c.bf16 %v998_v35, %v996_v34  ;;  %v1496_v41 = vpack.c.bf16 %v1109_v36, %v1108_v29  ;;  %v774_v9 = vrot.slane %v765_v42, %v2087_v11  ;;  %v1110_v50 = vld [vmem:[%s2421_s11 + $0x90] sm:$0xff]  ;;  %v1111_v53 = vld [vmem:[%s2421_s11 + $0x98] sm:$0xff]  ;;  %v1105_v33 = vld [vmem:[%s2421_s11 + $0x68] sm:$0xff] }
 0x122   :  { %918 = vmatprep.mubr.f32.mxu0 %v632_v47  ;;  %v636_v28 = vmax.f32 %v628_v27, 0.0  ;;  %v1103_v27 = vld [vmem:[%s2421_s11 + $0x58] sm:$0xff]  ;;  %v1522_v34 = vpack.c.bf16 %v1105_v33, %v1104_v32  ;;  %v1122_v35 = vld [vmem:[%s2421_s11 + $0xf0] sm:$0xff]  ;;  %v999_v36 = vld [vmem:[%s2420_s10] sm:$0x3] }
 0x123   :  { %1493 = vmatprep.subr.bf16.mxu1 %v1492_v37  ;;  %v1123_v37 = vld [vmem:[%s2421_s11 + $0xf8] sm:$0xff]  ;;  %v1106_v39 = vld [vmem:[%s2421_s11 + $0x70] sm:$0xff]  ;;  %v1008_v42 = vrot.slane %v999_v36, %v2087_v11 }
 0x124   :  { %1403 = vmatpush1.bf16.msra.mxu0 %v1402_v48  ;;  %1495 = vmatpush1.bf16.msra.mxu1 %v1494_v40  ;;  %v1524_v14 = vpack.c.bf16 %v1123_v37, %v1122_v35  ;;  %v1107_v40 = vld [vmem:[%s2421_s11 + $0x78] sm:$0xff] }
 0x125   :  { %1405 = vmatprep.subr.bf16.mxu0 %v1404_v49  ;;  %1497 = vmatprep.subr.bf16.mxu1 %v1496_v41  ;;  %v1092_v49 = vld [vmem:[%s2421_s11] sm:$0xff]  ;;  %v1526_v29 = vpack.c.bf16 %v1107_v40, %v1106_v39  ;;  %v1004_v41 = vrot.slane %v999_v36, %v2084_v6 }
 0x126   :  { %v1498_v56 = vpack.c.bf16 %v1093_v51, %v1092_v49  ;;  %v1225_v6 = vld [vmem:[%s2422_s12] ss:$0 sm:$0xff] }
 0x128   :  { %1407 = vmatpush1.bf16.msra.mxu0 %v1406_v54 }
 0x129   :  { %1409 = vmatprep.subr.bf16.mxu0 %v1408_v55 }
 0x12c   :  { %1411 = vmatpush1.bf16.msra.mxu0 %v1410_v60  ;;  %v1500_v60 = vpack.c.bf16 %v1111_v53, %v1110_v50 }
 0x12d   :  { %1413 = vmatprep.subr.bf16.mxu0 %v1412_v62  ;;  %v1094_v62 = vld [vmem:[%s2421_s11 + $0x10] sm:$0xff] }
 0x130   :  { %1415 = vmatpush1.bf16.msra.mxu0 %v1414_v5 }
 0x131   :  { %1417 = vmatprep.subr.bf16.mxu0 %v1416_v13  ;;  %v1502_v13 = vpack.c.bf16 %v1095_v63, %v1094_v62 }
 0x134   :  { %1419 = vmatpush1.bf16.msra.mxu0 %v1418_v12  ;;  %v1114_v12 = vld [vmem:[%s2421_s11 + $0xb0] sm:$0xff] }
 0x135   :  { %1421 = vmatprep.subr.bf16.mxu0 %v1420_v61  ;;  %v1115_v61 = vld [vmem:[%s2421_s11 + $0xb8] sm:$0xff] }
 0x136   :  { %v1508_v0 = vpack.c.bf16 %v1115_v61, %v1114_v12 }
 0x138   :  { %1423 = vmatpush1.bf16.msra.mxu0 %v1422_v17  ;;  %v1116_v17 = vld [vmem:[%s2421_s11 + $0xc0] sm:$0xff] }
 0x139   :  { %1425 = vmatprep.subr.bf16.mxu0 %v1424_v44  ;;  %v1117_v44 = vld [vmem:[%s2421_s11 + $0xc8] sm:$0xff] }
 0x13a   :  { %v1512_v19 = vpack.c.bf16 %v1117_v44, %v1116_v17 }
 0x13c   :  { %1427 = vmatpush1.bf16.msra.mxu0 %v1426_v22  ;;  %v1118_v22 = vld [vmem:[%s2421_s11 + $0xd0] sm:$0xff] }
 0x13d   :  { %1429 = vmatprep.subr.bf16.mxu0 %v1428_v23  ;;  %v1119_v23 = vld [vmem:[%s2421_s11 + $0xd8] sm:$0xff] }
 0x13e   :  { %v1516_v25 = vpack.c.bf16 %v1119_v23, %v1118_v22 }
 0x140   :  { %1431 = vmatpush1.bf16.msra.mxu0 %v1430_v26  ;;  %v1102_v26 = vld [vmem:[%s2421_s11 + $0x50] sm:$0xff] }
 0x143   :  { %919 = vmatmul.mubr.f32.vlgmr.msra.gmra.mrb[6].mxu0 %v631_v43  ;;  %v1120_v43 = vld [vmem:[%s2421_s11 + $0xe0] sm:$0xff] }
 0x144   :  { %924 = vmatprep.mubr.f32.mxu0 %v636_v28  ;;  %v1121_v28 = vld [vmem:[%s2421_s11 + $0xe8] sm:$0xff] }
 0x145   :  { %v1520_v31 = vpack.c.bf16 %v1121_v28, %v1120_v43 }
 0x147   :  { %925 = vmatmul.mubr.f32.gmra.mrb[8].mxu0 %v635_v30  ;;  %v1518_v30 = vpack.c.bf16 %v1103_v27, %v1102_v26 }
 0x216   :  { %v920_v46 = vpop.f32.mrb[6].mxu0 }
 0x217   :  { %v1538_v47 = vadd.f32 %v920_v46, %v770_v45  ;;  %v922_v48 = vpop.f32.mrb[7].mxu0 }
 0x218   :  { %v1539_v52 = vadd.f32 %v922_v48, %v774_v9 }
 0x219   :  { %v931_v57 = vmax.f32 %v1538_v47, 0.0 }
 0x21a   :  { %v932_v54 = vmax.f32 %v1539_v52, 0.0  ;;  %v926_v55 = vpop.f32.mrb[8].mxu0 }
 0x21b   :  { %v1540_v58 = vadd.f32 %v926_v55, %v770_v45  ;;  %v928_v59 = vpop.f32.mrb[9].mxu0 }
 0x21c   :  { %v1541_v2 = vadd.f32 %v928_v59, %v774_v9  ;;  %1075 = vmatprep.mubr.f32.mxu1 %v932_v54 }
 0x21d   :  { %1076 = vmatmul.mubr.f32.vlgmr.msra.gmra.mrb[10].mxu1 %v931_v57  ;;  %v933_v7 = vmax.f32 %v1540_v58, 0.0 }
 0x21e   :  { %v934_v5 = vmax.f32 %v1541_v2, 0.0  ;;  %1499 = vmatpush3.bf16.msra.mxu1 %v1498_v56 }
 0x21f   :  { %1501 = vmatprep.subr.bf16.mxu1 %v1500_v60 }
 0x220   :  { %1081 = vmatprep.mubr.f32.mxu1 %v934_v5 }
 0x221   :  { %1082 = vmatmul.mubr.f32.gmra.mrb[12].mxu1 %v933_v7 }
 0x222   :  { %1503 = vmatpush3.bf16.msra.mxu1 %v1502_v13 }
 0x223   :  { %1505 = vmatprep.subr.bf16.mxu1 %v1504_v8 }
 0x226   :  { %1507 = vmatpush3.bf16.msra.mxu1 %v1506_v1 }
 0x227   :  { %1509 = vmatprep.subr.bf16.mxu1 %v1508_v0 }
 0x22a   :  { %1511 = vmatpush3.bf16.msra.mxu1 %v1510_v18 }
 0x22b   :  { %1513 = vmatprep.subr.bf16.mxu1 %v1512_v19 }
 0x22e   :  { %1515 = vmatpush3.bf16.msra.mxu1 %v1514_v24 }
 0x22f   :  { %1517 = vmatprep.subr.bf16.mxu1 %v1516_v25 }
 0x232   :  { %1519 = vmatpush3.bf16.msra.mxu1 %v1518_v30 }
 0x233   :  { %1521 = vmatprep.subr.bf16.mxu1 %v1520_v31 }
 0x236   :  { %1523 = vmatpush3.bf16.msra.mxu1 %v1522_v34 }
 0x237   :  { %1525 = vmatprep.subr.bf16.mxu1 %v1524_v14 }
 0x23a   :  { %1527 = vmatpush3.bf16.msra.mxu1 %v1526_v29 }
 0x2f0   :  { %v1077_v45 = vpop.f32.mrb[10].mxu1 }
 0x2f1   :  { %v1078_v9 = vadd.f32 %v1077_v45, %v1004_v41  ;;  %v1079_v46 = vpop.f32.mrb[11].mxu1 }
 0x2f2   :  { %v1080_v47 = vadd.f32 %v1079_v46, %v1008_v42 }
 0x2f3   :  { %v1088_v51 = vmax.f32 %v1078_v9, 0.0 }
 0x2f4   :  { %v1089_v48 = vmax.f32 %v1080_v47, 0.0  ;;  %v1083_v49 = vpop.f32.mrb[12].mxu1 }
 0x2f5   :  { %v1084_v52 = vadd.f32 %v1083_v49, %v1004_v41  ;;  %v1085_v50 = vpop.f32.mrb[13].mxu1 }
 0x2f6   :  { %v1086_v53 = vadd.f32 %v1085_v50, %v1008_v42  ;;  %1195 = vmatprep.mubr.f32.mxu1 %v1089_v48 }
 0x2f7   :  { %1196 = vmatmul.mubr.f32.vlgmr.msra.gmra.mrb[14].mxu1 %v1088_v51  ;;  %v1090_v55 = vmax.f32 %v1084_v52, 0.0 }
 0x2f8   :  { %v1091_v54 = vmax.f32 %v1086_v53, 0.0 }
 0x2fa   :  { %1200 = vmatprep.mubr.f32.mxu1 %v1091_v54 }
 0x2fb   :  { %1201 = vmatmul.mubr.f32.gmra.mrb[16].mxu1 %v1090_v55 }
 0x3ca   :  { %v1258_v56 = vpop.f32.mrb[14].mxu1 }
 0x3cb   :  { %v1259_v11 = vpop.f32.mrb[15].mxu1 }
 0x3cc   :  { %v1260_v57 = vadd.f32 %v1259_v11, %v1258_v56 }
 0x3ce   :  { %v1198_v58 = vadd.f32 %v1260_v57, %v1225_v6  ;;  %v1261_v59 = vpop.f32.mrb[16].mxu1 }
 0x3cf   :  { %v1262_v60 = vpop.f32.mrb[17].mxu1 }
 0x3d0   :  { %1206 = vst [vmem:[%s2423_s13] sm:$0xff] %v1198_v58  ;;  %v1263_v62 = vadd.f32 %v1262_v60, %v1261_v59 }
 0x3d2   :  { %v1203_v63 = vadd.f32 %v1263_v62, %v1225_v6 }
 0x3d4   :  { %1207 = vst [vmem:[%s2423_s13 + $0x8] sm:$0xff] %v1203_v63 }
 0x3d5   :  { %1212 = vsyncpa [#allocation3], 1 }

</bundles_post_ra>
